<compile_context>
chip_gen: v7x
topology: tpu7x:2x2x1
jax: 0.10.0
libtpu: 0.0.40
codegen_flags: <defaults>
</compile_context>

<pallas_src>
import functools
import math

import jax
import jax.numpy as jnp
from jax.experimental import pallas as pl
from jax.experimental.pallas import tpu as pltpu


def _attention_head_kernel(x_ref, wq_ref, bq_ref, wk_ref, bk_ref, wv_ref,
                           bv_ref, o_ref, *, scale):
    """Fused: q/k/v = x @ W*^T + b*;  out = softmax(q k^T * scale) @ v."""
    x = x_ref[0]                                   # [S, E], input dtype (no upcast)

    # Contract last dim of both operands => x @ W^T without materializing a
    # transposed weight tile; MXU gets fed directly, accumulates in f32.
    dn = (((1,), (1,)), ((), ()))
    q = jax.lax.dot_general(x, wq_ref[...], dn,
                            preferred_element_type=jnp.float32) + bq_ref[...]
    k = jax.lax.dot_general(x, wk_ref[...], dn,
                            preferred_element_type=jnp.float32) + bk_ref[...]
    v = jax.lax.dot_general(x, wv_ref[...], dn,
                            preferred_element_type=jnp.float32) + bv_ref[...]

    # scores = q @ k^T / sqrt(head_dim)   (contract head_dim of both)
    scores = jax.lax.dot_general(q, k, dn,
                                 preferred_element_type=jnp.float32) * scale

    # numerically stable softmax over the key axis (exp runs on the EUP)
    m = jnp.max(scores, axis=-1, keepdims=True)
    p = jnp.exp(scores - m)
    denom = jnp.sum(p, axis=-1, keepdims=True)
    weights = p / denom

    out = jnp.dot(weights, v, preferred_element_type=jnp.float32)
    o_ref[0] = out.astype(o_ref.dtype)


@jax.jit
def attention_head(x, wq, bq, wk, bk, wv, bv):
    """x: [B, S, E].  W*: [Hd, E], b*: [Hd].  Returns [B, S, Hd]."""
    B, S, E = x.shape
    Hd = wq.shape[0]
    scale = 1.0 / math.sqrt(Hd)

    kernel = functools.partial(_attention_head_kernel, scale=scale)

    # Weights/biases are grid-invariant (constant (0,0) index_map) => they stay
    # resident in VMEM; only the per-batch activation tile streams.
    weight_spec = pl.BlockSpec((Hd, E), lambda b: (0, 0))
    bias_spec = pl.BlockSpec((1, Hd), lambda b: (0, 0))

    # TODO(synk): for long sequences, add a query-tile grid axis with a
    # flash-style online softmax over key tiles instead of full-seq blocks.
    out = pl.pallas_call(
        kernel,
        out_shape=jax.ShapeDtypeStruct((B, S, Hd), x.dtype),
        grid_spec=pltpu.PrefetchScalarGridSpec(
            num_scalar_prefetch=0,
            grid=(B,),
            in_specs=[
                pl.BlockSpec((1, S, E), lambda b: (b, 0, 0)),   # hidden_state
                weight_spec, bias_spec,                         # q proj
                weight_spec, bias_spec,                         # k proj
                weight_spec, bias_spec,                         # v proj
            ],
            out_specs=pl.BlockSpec((1, S, Hd), lambda b: (b, 0, 0)),
        ),
        compiler_params=pltpu.CompilerParams(
            dimension_semantics=("parallel",)),
    )(x, wq, bq.reshape(1, Hd), wk, bk.reshape(1, Hd), wv, bv.reshape(1, Hd))

    return out


def _reference(x, wq, bq, wk, bk, wv, bv):
    q = x @ wq.T + bq
    k = x @ wk.T + bk
    v = x @ wv.T + bv
    dim_k = q.shape[-1]
    scores = jnp.einsum("bqd,bkd->bqk", q, k) / jnp.sqrt(jnp.float32(dim_k))
    weights = jax.nn.softmax(scores, axis=-1)
    return jnp.einsum("bqk,bkd->bqd", weights, v)


if __name__ == "__main__":
    # Small synthetic config: embed_dim=32, head_dim=8 (as in a 4-head model),
    # batch=2, seq=8.
    B, S, E, Hd = 2, 8, 32, 8

    key = jax.random.PRNGKey(0)
    kx, kq, kbq, kk, kbk, kv, kbv = jax.random.split(key, 7)

    x = jax.random.normal(kx, (B, S, E), dtype=jnp.float32)
    # nn.Linear-style deterministic init (uniform in +-1/sqrt(fan_in))
    bound = 1.0 / math.sqrt(E)
    wq = jax.random.uniform(kq, (Hd, E), jnp.float32, -bound, bound)
    bq = jax.random.uniform(kbq, (Hd,), jnp.float32, -bound, bound)
    wk = jax.random.uniform(kk, (Hd, E), jnp.float32, -bound, bound)
    bk = jax.random.uniform(kbk, (Hd,), jnp.float32, -bound, bound)
    wv = jax.random.uniform(kv, (Hd, E), jnp.float32, -bound, bound)
    bv = jax.random.uniform(kbv, (Hd,), jnp.float32, -bound, bound)

    y = attention_head(x, wq, bq, wk, bk, wv, bv)
    jax.block_until_ready(y)

    y_ref = _reference(x, wq, bq, wk, bk, wv, bv)
    assert y.shape == (B, S, Hd), f"bad shape {y.shape}"
    assert jnp.allclose(y, y_ref, atol=1e-4, rtol=1e-4), "mismatch vs reference"

    print("KERNEL_OK")
</pallas_src>

<mosaic_0001>
module attributes {stable_mosaic.version = 11 : i64} {
  func.func @_attention_head_kernel(%arg0: i32, %arg1: memref<1x8x32xf32, #tpu.memory_space<vmem>>, %arg2: memref<8x32xf32, #tpu.memory_space<vmem>>, %arg3: memref<1x8xf32, #tpu.memory_space<vmem>>, %arg4: memref<8x32xf32, #tpu.memory_space<vmem>>, %arg5: memref<1x8xf32, #tpu.memory_space<vmem>>, %arg6: memref<8x32xf32, #tpu.memory_space<vmem>>, %arg7: memref<1x8xf32, #tpu.memory_space<vmem>>, %arg8: memref<1x8x8xf32, #tpu.memory_space<vmem>>) attributes {dimension_semantics = [#tpu.dimension_semantics<parallel>], iteration_bounds = array<i64: 2>, scalar_prefetch = 0 : i64, scratch_operands = 0 : i64, tpu.core_type = #tpu.core_type<tc>, window_params = [{transform_indices = @transform_0, window_bounds = array<i64: 1, 8, 32>}, {pipeline_mode = #tpu.pipeline_mode<synchronous>, transform_indices = @transform_1, window_bounds = array<i64: 8, 32>}, {pipeline_mode = #tpu.pipeline_mode<synchronous>, transform_indices = @transform_2, window_bounds = array<i64: 1, 8>}, {pipeline_mode = #tpu.pipeline_mode<synchronous>, transform_indices = @transform_3, window_bounds = array<i64: 8, 32>}, {pipeline_mode = #tpu.pipeline_mode<synchronous>, transform_indices = @transform_4, window_bounds = array<i64: 1, 8>}, {pipeline_mode = #tpu.pipeline_mode<synchronous>, transform_indices = @transform_5, window_bounds = array<i64: 8, 32>}, {pipeline_mode = #tpu.pipeline_mode<synchronous>, transform_indices = @transform_6, window_bounds = array<i64: 1, 8>}, {transform_indices = @transform_7, window_bounds = array<i64: 1, 8, 8>}]} {
    %c0 = arith.constant 0 : index
    %c0_0 = arith.constant 0 : index
    %c0_1 = arith.constant 0 : index
    %0 = vector.load %arg1[%c0, %c0_0, %c0_1] : memref<1x8x32xf32, #tpu.memory_space<vmem>>, vector<1x8x32xf32>
    %1 = vector.shape_cast %0 : vector<1x8x32xf32> to vector<8x32xf32>
    %c0_2 = arith.constant 0 : index
    %c0_3 = arith.constant 0 : index
    %2 = vector.load %arg2[%c0_2, %c0_3] : memref<8x32xf32, #tpu.memory_space<vmem>>, vector<8x32xf32>
    %cst = arith.constant dense<0.000000e+00> : vector<8x8xf32>
    %3 = tpu.matmul %1, %2, %cst {dimension_numbers = #tpu.dot_dimension_numbers<[1], [1], [0], [0], [0, 0, 1, 0], [], []>} : vector<8x32xf32>, vector<8x32xf32>, vector<8x8xf32> -> vector<8x8xf32>
    %c0_4 = arith.constant 0 : index
    %c0_5 = arith.constant 0 : index
    %4 = vector.load %arg3[%c0_4, %c0_5] : memref<1x8xf32, #tpu.memory_space<vmem>>, vector<1x8xf32>
    %5 = vector.broadcast %4 : vector<1x8xf32> to vector<8x8xf32>
    %6 = arith.addf %3, %5 : vector<8x8xf32>
    %c0_6 = arith.constant 0 : index
    %c0_7 = arith.constant 0 : index
    %7 = vector.load %arg4[%c0_6, %c0_7] : memref<8x32xf32, #tpu.memory_space<vmem>>, vector<8x32xf32>
    %cst_8 = arith.constant dense<0.000000e+00> : vector<8x8xf32>
    %8 = tpu.matmul %1, %7, %cst_8 {dimension_numbers = #tpu.dot_dimension_numbers<[1], [1], [0], [0], [0, 0, 1, 0], [], []>} : vector<8x32xf32>, vector<8x32xf32>, vector<8x8xf32> -> vector<8x8xf32>
    %c0_9 = arith.constant 0 : index
    %c0_10 = arith.constant 0 : index
    %9 = vector.load %arg5[%c0_9, %c0_10] : memref<1x8xf32, #tpu.memory_space<vmem>>, vector<1x8xf32>
    %10 = vector.broadcast %9 : vector<1x8xf32> to vector<8x8xf32>
    %11 = arith.addf %8, %10 : vector<8x8xf32>
    %c0_11 = arith.constant 0 : index
    %c0_12 = arith.constant 0 : index
    %12 = vector.load %arg6[%c0_11, %c0_12] : memref<8x32xf32, #tpu.memory_space<vmem>>, vector<8x32xf32>
    %cst_13 = arith.constant dense<0.000000e+00> : vector<8x8xf32>
    %13 = tpu.matmul %1, %12, %cst_13 {dimension_numbers = #tpu.dot_dimension_numbers<[1], [1], [0], [0], [0, 0, 1, 0], [], []>} : vector<8x32xf32>, vector<8x32xf32>, vector<8x8xf32> -> vector<8x8xf32>
    %c0_14 = arith.constant 0 : index
    %c0_15 = arith.constant 0 : index
    %14 = vector.load %arg7[%c0_14, %c0_15] : memref<1x8xf32, #tpu.memory_space<vmem>>, vector<1x8xf32>
    %15 = vector.broadcast %14 : vector<1x8xf32> to vector<8x8xf32>
    %16 = arith.addf %13, %15 : vector<8x8xf32>
    %cst_16 = arith.constant dense<0.000000e+00> : vector<8x8xf32>
    %17 = tpu.matmul %6, %11, %cst_16 {dimension_numbers = #tpu.dot_dimension_numbers<[1], [1], [0], [0], [0, 0, 1, 0], [], []>} : vector<8x8xf32>, vector<8x8xf32>, vector<8x8xf32> -> vector<8x8xf32>
    %cst_17 = arith.constant 0.353553385 : f32
    %18 = vector.broadcast %cst_17 : f32 to vector<8x8xf32>
    %19 = arith.mulf %17, %18 : vector<8x8xf32>
    %cst_18 = arith.constant dense<0xFF800000> : vector<8xf32>
    %20 = vector.multi_reduction <maximumf>, %19, %cst_18 [1] : vector<8x8xf32> to vector<8xf32>
    %21 = vector.shape_cast %20 : vector<8xf32> to vector<8x1xf32>
    %22 = vector.broadcast %21 : vector<8x1xf32> to vector<8x8xf32>
    %23 = arith.subf %19, %22 : vector<8x8xf32>
    %24 = math.exp %23 : vector<8x8xf32>
    %cst_19 = arith.constant dense<0.000000e+00> : vector<8xf32>
    %25 = vector.multi_reduction <add>, %24, %cst_19 [1] : vector<8x8xf32> to vector<8xf32>
    %26 = vector.shape_cast %25 : vector<8xf32> to vector<8x1xf32>
    %27 = vector.broadcast %26 : vector<8x1xf32> to vector<8x8xf32>
    %28 = arith.divf %24, %27 : vector<8x8xf32>
    %cst_20 = arith.constant dense<0.000000e+00> : vector<8x8xf32>
    %29 = tpu.matmul %28, %16, %cst_20 {dimension_numbers = #tpu.dot_dimension_numbers<[1], [0], [0], [1], [0, 0, 1, 1], [], []>} : vector<8x8xf32>, vector<8x8xf32>, vector<8x8xf32> -> vector<8x8xf32>
    %c0_21 = arith.constant 0 : index
    %c0_22 = arith.constant 0 : index
    %c0_23 = arith.constant 0 : index
    %30 = vector.load %arg8[%c0_21, %c0_22, %c0_23] : memref<1x8x8xf32, #tpu.memory_space<vmem>>, vector<1x8x8xf32>
    %31 = vector.shape_cast %30 : vector<1x8x8xf32> to vector<8x8xf32>
    %32 = vector.shape_cast %29 : vector<8x8xf32> to vector<1x8x8xf32>
    tpu.vector_store %arg8[%c0_21, %c0_22, %c0_23], %32 {strides = array<i32>} : memref<1x8x8xf32, #tpu.memory_space<vmem>>, vector<1x8x8xf32>,
    return
  }
  func.func @transform_0(%arg0: i32) -> (i32, i32, i32) {
    %c0_i32 = arith.constant 0 : i32
    %c0_i32_0 = arith.constant 0 : i32
    %c0_i32_1 = arith.constant 0 : i32
    return %arg0, %c0_i32, %c0_i32_0 : i32, i32, i32
  }
  func.func @transform_1(%arg0: i32) -> (i32, i32) {
    %c0_i32 = arith.constant 0 : i32
    %c0_i32_0 = arith.constant 0 : i32
    %c0_i32_1 = arith.constant 0 : i32
    return %c0_i32, %c0_i32_0 : i32, i32
  }
  func.func @transform_2(%arg0: i32) -> (i32, i32) {
    %c0_i32 = arith.constant 0 : i32
    %c0_i32_0 = arith.constant 0 : i32
    %c0_i32_1 = arith.constant 0 : i32
    return %c0_i32, %c0_i32_0 : i32, i32
  }
  func.func @transform_3(%arg0: i32) -> (i32, i32) {
    %c0_i32 = arith.constant 0 : i32
    %c0_i32_0 = arith.constant 0 : i32
    %c0_i32_1 = arith.constant 0 : i32
    return %c0_i32, %c0_i32_0 : i32, i32
  }
  func.func @transform_4(%arg0: i32) -> (i32, i32) {
    %c0_i32 = arith.constant 0 : i32
    %c0_i32_0 = arith.constant 0 : i32
    %c0_i32_1 = arith.constant 0 : i32
    return %c0_i32, %c0_i32_0 : i32, i32
  }
  func.func @transform_5(%arg0: i32) -> (i32, i32) {
    %c0_i32 = arith.constant 0 : i32
    %c0_i32_0 = arith.constant 0 : i32
    %c0_i32_1 = arith.constant 0 : i32
    return %c0_i32, %c0_i32_0 : i32, i32
  }
  func.func @transform_6(%arg0: i32) -> (i32, i32) {
    %c0_i32 = arith.constant 0 : i32
    %c0_i32_0 = arith.constant 0 : i32
    %c0_i32_1 = arith.constant 0 : i32
    return %c0_i32, %c0_i32_0 : i32, i32
  }
  func.func @transform_7(%arg0: i32) -> (i32, i32, i32) {
    %c0_i32 = arith.constant 0 : i32
    %c0_i32_0 = arith.constant 0 : i32
    %c0_i32_1 = arith.constant 0 : i32
    return %arg0, %c0_i32, %c0_i32_0 : i32, i32, i32
  }
}

</mosaic_0001>

<bundles_post_ra>
// kernel: attention_head.1
= control target key start
LH: loop header
LB: loop body
LE: loop exit
PB: predicated region body
PF: predicated region fallthrough
CT: control target
= control target key end

     0   :  { %12 = vsyncpa [#allocation3], 0  ;;  %s1242_s0 = inlined_call_operand.hbm [shape: f32[2,8,32], index: 0, kind: input, shape index: {}]   ;;  %s1243_s1 = inlined_call_operand.vmem [shape: f32[8,32], index: 1, kind: input, shape index: {}]   ;;  %s1244_s2 = inlined_call_operand.vmem [shape: f32[1,8], index: 2, kind: input, shape index: {}]   ;;  %s1245_s3 = inlined_call_operand.vmem [shape: f32[8,32], index: 3, kind: input, shape index: {}]   ;;  %s1246_s4 = inlined_call_operand.vmem [shape: f32[1,8], index: 4, kind: input, shape index: {}]   ;;  %s1247_s5 = inlined_call_operand.vmem [shape: f32[8,32], index: 5, kind: input, shape index: {}]   ;;  %s1248_s6 = inlined_call_operand.vmem [shape: f32[1,8], index: 6, kind: input, shape index: {}]   ;;  %s1249_s7 = inlined_call_operand.hbm [shape: f32[2,8,8], index: 7, kind: output, shape index: {}]  }
   0x1   :  { %14 = vsyncpa [#allocation3 + $0x1], 0 }
   0x2   :  { %15 = vsyncpa [#allocation4], 0 }
   0x3   :  { %17 = vsyncpa [#allocation4 + $0x1], 0  ;;  %s1042_s24 = smov 0   ;;  %s1044_s25 = smov 0  }
   0x4   :  { %s1046_s26 = smov 0   ;;  %s1048_s27 = smov 0  }
   0x5 LB: > { %s1063_s28 = sadd.s32 4294967295, %s996_s27   ;;  %s789_s29 = sadd.s32 4294967294, %s996_s27   ;;  %s996_s27 = sphi %s1048_s27, %s1264_s27   ;;  %s992_s26 = sphi %s1046_s26, %s1263_s26   ;;  %s988_s25 = sphi %s1044_s25, %s1262_s25   ;;  %s984_s24 = sphi %s1042_s24, %s1261_s24  }
   0x6   : > { %s1067_s30 = sadd.s32 1, %s996_s27   ;;  %s30_s8 = sadd.s32 1, %s992_s26 }
   0x7   : > { %s27_s9 = ssub.s32 %s996_s27, %s1067_s30  ;;  %p37_p0 = scmp.ne.s32.totalorder %s992_s26, %s988_s25 }
   0x8   : > { %p28_p1 = scmp.eq.s32.totalorder %s27_s9, 0  ;;  %p38_p2 = scmp.eq.s32.totalorder %s996_s27, 0 }
   0x9   : > { %p43_p3 = scmp.ne.s32.totalorder %s988_s25, %s984_s24  ;;  %p44_p4 = scmp.eq.s32.totalorder %s1063_s28, 0 }
   0xa   : > { %s1079_s10 = scalar_select %p28_p1, %s992_s26, %s30_s8  }
   0xb   : > { %p1081_p5 = por %p38_p2, %p37_p0  ;;  %p1085_p6 = por %p44_p4, %p43_p3 }
   0xc   : > { %p193_p7 = scmp.eq.s32.totalorder %s1063_s28, 1  ;;  %p199_p8 = scmp.eq.s32.totalorder %s789_s29, 1 }
   0xd   : > { %p860_p10 = scmp.lt.s32.totalorder %s996_s27, 2  ;;  %s237_s15 = sand.u32 1, %s992_s26  }
   0xe   : > { %p1092_p11 = por %p193_p7, %p37_p0  ;;  %p1096_p12 = por %p199_p8, %p43_p3 }
   0xf   : > { %s793_s16 = sshll.u32 %s996_s27, 7  ;;  %s792_s17 = sshll.u32 %s237_s15, 3 }
  0x10   : > { %s1253_s13 = scalar_select %p1092_p11, 1, 0 }
  0x11   : > { %s1254_s14 = scalar_select %p1096_p12, 1, 0 }
  0x12   : > { %s1105_s20 = scalar_lea.hbm %s1242_s0, %s793_s16  ;;  %s241_s21 = scalar_lea.vmem [#allocation2], %s792_s17 }
  0x13   : > { %s248_s22 = sshll.u32 %s241_s21, 4  ;;  %p1109_p13 = pnand %p860_p10, %p1081_p5  ;;  %s1113_s22 = int_to_ptr.vmem [resolvable:$true] %s248_s22 }
  0x14   : > { %s238_s29 = scalar_lea.sflag [#allocation3], %s237_s15  ;;  %s900_s8 = scalar_lea.hbm %s1105_s20, 128 }
  0x15   : > { %p901_p2 = scmp.ne.s32.totalorder %s1105_s20, %s900_s8  ;;  %p902_p3 = pneg %p1109_p13 }
  0x16   : > { %s905_s16 = scalar_lea.hbm %s1242_s0, 256  ;;  %p906_p5 = scmp.lt.u32.totalorder %s1105_s20, %s1242_s0 }
  0x17   : > { %p903_p4 = pnand %p902_p3, %p901_p2  ;;  %p907_p8 = scmp.lt.u32.totalorder %s905_s16, %s900_s8 }
  0x18   : > { %p909_p9 = scmp.lt.u32.totalorder %s900_s8, %s1105_s20 }
  0x19   : > { %p904_p7 = pneg %p903_p4  ;;  %p908_p10 = por %p907_p8, %p906_p5 }
  0x1b   : > { %p910_p0 = por %p909_p9, %p908_p10 }
  0x1d   : > { %p911_p1 = pnand %p910_p0, %p904_p7 }
  0x1f   : > { %914 = shalt.err (!%p911_p1)
}
  0x20   : > { %s915_s15 = scalar_lea.vmem %s1113_s22, 128  ;;  %s998_s19 = smov [#allocation2]  }
  0x21   : > { %p916_p2 = scmp.ne.s32.totalorder %s1113_s22, %s915_s15  ;;  %s920_s21 = sshll.u32 %s998_s19, 4  ;;  %s921_s21 = int_to_ptr.vmem [resolvable:$false] %s920_s21 }
  0x22   : > { %s922_s9 = scalar_lea.vmem %s921_s21, 256  ;;  %p923_p11 = scmp.lt.s32.totalorder %s1113_s22, %s921_s21 }
  0x23   : > { %p918_p4 = pnand %p916_p2, %p902_p3  ;;  %p924_p5 = scmp.lt.s32.totalorder %s922_s9, %s915_s15 }
  0x25   : > { %p919_p12 = pneg %p918_p4  ;;  %p925_p8 = por %p924_p5, %p923_p11 }
  0x27   : > { %p926_p9 = pnand %p925_p8, %p919_p12 }
  0x29   : > { %929 = shalt.err (!%p926_p9)
}
  0x2a   : > { %855 = dma.hbm_to_vmem [thread:$0]  (!%p1109_p13), %s1105_s20, 128, %s1113_s22, %s238_s29  }
  0x2b   : > { %p1256_p0 = scmp.lt.s32.totalorder %s996_s27, 3  ;;  %p1257_p1 = scmp.ge.s32.totalorder %s996_s27, 1 }
  0x2d   : > { %p254_p3 = pnand %p1257_p1, %p1256_p0 }
  0x2e   : > { %s1147_s8 = sand.u32 (!%p254_p3), 1, %s988_s25  }
  0x2f   : > { %257 = sbr.rel (%p254_p3) target bundleno = 1032 (0x408), region = 48  ;;  %s795_s11 = sshll.u32 (!%p254_p3), %s1147_s8, 3 }
  0x30   : > { %s260_s16 = scalar_lea.sflag (!%p254_p3), [#allocation3], %s1147_s8  ;;  %s263_s23 = scalar_lea.vmem (!%p254_p3), [#allocation2], %s795_s11 }
  0x36   : > { %975 = dma.done.wait (%p1085_p6), %s260_s16, 128  }
  0x37   : > { %977 = vsyncadd (%p1085_p6), %s260_s16, 4294967168  ;;  %v999_v0 = vmov 0.0   ;;  %vm1000_vm0 = vmmov 0   ;;  %vm303_vm1 = vcmask 261120   ;;  %v380_v1 = vld [vmem:[%s1245_s3] sm:$0xff]  ;;  %vm542_vm2 = vcmask 64512  }
  0x38   : > { %828 = vmatprep.subr.mxu1 %v999_v0  ;;  %823 = vmatprep.subr.mxu0 %v999_v0  ;;  %v295_v2 = vld [vmem:[%s1243_s1] sm:$0xff]  ;;  %s810_s20 = sshll.u32 %s1063_s28, 7  ;;  %s293_s22 = scalar_lea.vmem [#allocation5], %s795_s11 }
  0x39   : > { %830 = vmatprep.mubr.msk.f32.mxu1 %vm1000_vm0, %v999_v0  ;;  %825 = vmatprep.mubr.msk.f32.mxu0 %vm1000_vm0, %v999_v0  ;;  %v294_v3 = vld [vmem:[%s263_s23] sm:$0xff]  ;;  %s719_s29 = sshll.u32 %s293_s22, 4  ;;  %s1197_s18 = scalar_lea.hbm %s1249_s7, %s810_s20  ;;  %s1199_s29 = int_to_ptr.vmem [resolvable:$true] %s719_s29 }
  0x3a   : > { %829 = vmatpush3.xpose.msk.msra.mxu1 %vm303_vm1, %v380_v1  ;;  %824 = vmatpush3.xpose.msk.msra.mxu0 %vm303_vm1, %v295_v2  ;;  %v800_v4 = vld [vmem:[%s1246_s4] ss:$0 sm:$0xff]  ;;  %s706_s15 = scalar_lea.sflag [#allocation4], %s1147_s8  ;;  %s930_s19 = scalar_lea.vmem %s1199_s29, 128 }
  0x3b   : > { %838 = vmatprep.subr.mxu1 %v999_v0  ;;  %833 = vmatprep.subr.mxu0 %v999_v0  ;;  %v797_v5 = vld [vmem:[%s1244_s2] ss:$0 sm:$0xff]  ;;  %p931_p6 = scmp.ne.s32.totalorder %s1199_s29, %s930_s19  ;;  %p1258_p11 = scmp.ne.s32.totalorder %s1253_s13, 0 }
  0x3c   : > { %v461_v12 = vld [vmem:[%s1247_s5] sm:$0xff]  ;;  %s1001_s28 = smov [#allocation5]  }
  0x3d   : > { %831 = vmatmul.mubr.msk.f32.vlgmr.msra.gmra.mrb[0].mxu1 %vm303_vm1, %v294_v3  ;;  %826 = vmatmul.mubr.msk.f32.vlgmr.msra.gmra.mrb[0].mxu0 %vm303_vm1, %v294_v3  ;;  %v803_v23 = vld [vmem:[%s1248_s6] ss:$0 sm:$0xff]  ;;  %p932_p12 = pnand %p931_p6, %p1258_p11  ;;  %s934_s11 = sshll.u32 %s1001_s28, 4  ;;  %s935_s11 = int_to_ptr.vmem [resolvable:$false] %s934_s11 }
  0x3e   : > { %840 = vmatprep.mubr.msk.f32.mxu1 %vm1000_vm0, %v999_v0  ;;  %835 = vmatprep.mubr.msk.f32.mxu0 %vm1000_vm0, %v999_v0  ;;  %s936_s21 = scalar_lea.vmem %s935_s11, 256  ;;  %p937_p7 = scmp.lt.s32.totalorder %s1199_s29, %s935_s11 }
  0x3f   : > { %834 = vmatpush3.xpose.msk.msra.mxu0 %vm303_vm1, %v461_v12  ;;  %p933_p13 = pneg %p932_p12  ;;  %p938_p10 = scmp.lt.s32.totalorder %s936_s21, %s930_s19 }
  0x40   : > { %843 = vmatprep.subr.mxu0 %v999_v0 }
  0x41   : > { %p939_p2 = por %p938_p10, %p937_p7 }
  0x42   : > { %836 = vmatmul.mubr.msk.f32.vlgmr.msra.gmra.mrb[2].mxu0 %vm303_vm1, %v294_v3 }
  0x43   : > { %845 = vmatprep.mubr.msk.f32.mxu0 %vm1000_vm0, %v999_v0  ;;  %p940_p4 = pnand %p939_p2, %p933_p13 }
 0x110   : > { %v457_v6 = vpop.f32.mrb[0].mxu1  ;;  %v376_v7 = vpop.f32.mrb[0].mxu0 }
 0x111   : > { %v458_v8 = vadd.f32 %v800_v4, %v457_v6  ;;  %v832_v9 = vpop.f32.mrb[1].mxu1  ;;  %v827_v10 = vpop.f32.mrb[1].mxu0  ;;  %v377_v11 = vadd.f32 %v797_v5, %v376_v7 }
 0x113   : > { %839 = vmatpush3.xpose.msk.msra.mxu1 %vm542_vm2, %v458_v8 }
 0x115   : > { %v538_v22 = vpop.f32.mrb[2].mxu0 }
 0x116   : > { %841 = vmatmul.mubr.msk.f32.vlgmr.msra.gmra.mrb[2].mxu1 %vm542_vm2, %v377_v11  ;;  %v837_v24 = vpop.f32.mrb[3].mxu0  ;;  %v539_v25 = vadd.f32 %v803_v23, %v538_v22 }
 0x118   : > { %844 = vmatpush3.msra.mxu0 %v539_v25 }
 0x1e9   : > { %v615_v13 = vpop.f32.mrb[2].mxu1 }
 0x1ea   : > { %v619_v14 = vmul.f32 0.35355338, %v615_v13  ;;  %v842_v15 = vpop.f32.mrb[3].mxu1 }
 0x1ec   : > { %v620_v16 = vsel %vm542_vm2, %v619_v14, -inf }
 0x1ed   : > { %621 = vmax.xlane.f32.xlu0 %v620_v16 }
 0x27a   : > { %v622_v17 = vpop.xlane.xlu0 %621 }
 0x27b   : > { %v623_v18 = vsub.f32 %v619_v14, %v622_v17 }
 0x27d   : > { %v624_v19 = vmul.f32 1.442695, %v623_v18 }
 0x27f   : > { %896 = vpow2.f32 %v624_v19 }
 0x289   : > { %v897_v20 = vpop.eup %896 }
 0x28a   : > { %v626_v21 = vsel %vm542_vm2, %v897_v20, 0.0 }
 0x28b   : > { %627 = vadd.xlane.f32.xlu0 %v626_v21 }
 0x318   : > { %v628_v26 = vpop.xlane.xlu0 %627 }
 0x319   : > { %898 = vrcp.f32 %v628_v26 }
 0x323   : > { %v899_v27 = vpop.eup %898 }
 0x324   : > { %v630_v28 = vmul.f32 %v899_v27, %v897_v20 }
 0x326   : > { %846 = vmatmul.mubr.msk.f32.vlgmr.msra.gmra.mrb[4].mxu0 %vm542_vm2, %v630_v28 }
 0x3f9   : > { %v700_v29 = vpop.f32.mrb[4].mxu0 }
 0x3fa   : > { %704 = vst.msk [vmem:[%s293_s22] sm:$0xff] %vm542_vm2, %v700_v29  ;;  %v847_v30 = vpop.f32.mrb[5].mxu0 }
 0x3fb   : > { %943 = shalt.err (!%p940_p4)
}
 0x3fc   : > { %s944_s8 = scalar_lea.hbm %s1197_s18, 128  ;;  %s948_s23 = scalar_lea.hbm %s1249_s7, 256 }
 0x3fd   : > { %p945_p5 = scmp.ne.s32.totalorder %s1197_s18, %s944_s8  ;;  %p949_p0 = scmp.lt.u32.totalorder %s1197_s18, %s1249_s7 }
 0x3fe   : > { %p950_p1 = scmp.lt.u32.totalorder %s948_s23, %s944_s8  ;;  %p952_p6 = scmp.lt.u32.totalorder %s944_s8, %s1197_s18 }
 0x3ff   : > { %p946_p8 = pnand %p945_p5, %p1258_p11 }
 0x400   : > { %p951_p3 = por %p950_p1, %p949_p0 }
 0x401   : > { %p947_p9 = pneg %p946_p8 }
 0x402   : > { %p953_p12 = por %p952_p6, %p951_p3 }
 0x404   : > { %p954_p13 = pnand %p953_p12, %p947_p9 }
 0x406   : > { %957 = shalt.err (!%p954_p13)
}
 0x407   : > { %850 = dma.vmem_to_hbm [thread:$0]  (%p1258_p11), %s1199_s29, 128, %s1197_s18, %s706_s15  }
 0x408 PF: > { %s731_s17 = sand.u32 1, %s984_s24   ;;  %p1259_p7 = scmp.ne.s32.totalorder %s1254_s14, 0 }
 0x409   : > { %p1260_p10 = scmp.ge.s32.totalorder %s996_s27, 2  ;;  %s732_s12 = scalar_lea.sflag [#allocation4], %s731_s17 }
 0x40b   : > { %p857_p2 = pnand %p1260_p10, %p1259_p7 }
 0x40d   : > { %979 = dma.done.wait (!%p857_p2), %s732_s12, 128  }
 0x40e   : > { %981 = vsyncadd (!%p857_p2), %s732_s12, 4294967168  ;;  %p20_p4 = scmp.ge.s32.totalorder %s1067_s30, 4   ;;  %s1261_s24 = smov %s988_s25 }
 0x40f   : > { %s1262_s25 = smov %s992_s26  ;;  %s1263_s26 = smov %s1079_s10 }
 0x410   : > { %s1264_s27 = smov %s1067_s30  ;;  %22 = sbr.rel (!%p20_p4) target bundleno = 5 (0x5), region = 93 }
 0x417   :  { %737 = vsyncpa [#allocation3], 1 }
 0x418   :  { %739 = vsyncpa [#allocation3 + $0x1], 1 }
 0x419   :  { %740 = vsyncpa [#allocation4], 1 }
 0x41a   :  { %742 = vsyncpa [#allocation4 + $0x1], 1 }

</bundles_post_ra>
